<compile_context>
chip_gen: v5e
topology: v5e:2x2
jax: 0.10.0
libtpu: 0.0.40
codegen_flags: <defaults>
</compile_context>

<pallas_src>
import functools

import numpy as np
import jax
import jax.numpy as jnp
from jax.experimental import pallas as pl
from jax.experimental.pallas import tpu as pltpu


# ---------------------------------------------------------------------------
# cv2.getGaussianKernel reimplementation (deterministic, no cv2 dependency)
# ---------------------------------------------------------------------------
_CV2_SMALL_GAUSSIAN_TAB = {
    1: np.array([1.0]),
    3: np.array([0.25, 0.5, 0.25]),
    5: np.array([0.0625, 0.25, 0.375, 0.25, 0.0625]),
    7: np.array([0.03125, 0.109375, 0.21875, 0.28125, 0.21875, 0.109375, 0.03125]),
}


def get_gaussian_kernel_1d(ksize, sigma):
    if sigma <= 0 and ksize in _CV2_SMALL_GAUSSIAN_TAB:
        k = _CV2_SMALL_GAUSSIAN_TAB[ksize].astype(np.float64)
    else:
        if sigma <= 0:
            sigma = 0.3 * ((ksize - 1) * 0.5 - 1) + 0.8
        x = np.arange(ksize, dtype=np.float64) - (ksize - 1) / 2.0
        k = np.exp(-(x * x) / (2.0 * sigma * sigma))
        k /= k.sum()
    return k.reshape(-1, 1)


def make_usm_kernels(radius=50, sigma=0):
    """Returns (k1d numpy (K,), k2d jnp (K, K)) matching the PyTorch module."""
    if radius % 2 == 0:
        radius += 1
    k1d = get_gaussian_kernel_1d(radius, sigma)
    k2d = np.dot(k1d, k1d.T).astype(np.float32)
    return k1d.reshape(-1), jnp.asarray(k2d)


def _round_up(x, m):
    return ((x + m - 1) // m) * m


def _reflect_corr_matrix(n, taps, pad):
    """(n, n) matrix M with (M @ x) == 1-D cross-correlation of reflect-padded x."""
    K = len(taps)
    m = np.zeros((n, n), dtype=np.float64)
    for i in range(n):
        for t in range(K):
            j = i + t - pad
            if j < 0:                       # reflect (no edge repeat); requires pad < n
                j = -j
            elif j >= n:
                j = 2 * (n - 1) - j
            m[i, j] += taps[t]
    return m


# ---------------------------------------------------------------------------
# Fused USM kernel: blur / residual / mask / soft-mask blur / blend in VMEM
# ---------------------------------------------------------------------------
def _usm_sharp_kernel(img_ref, a_ref, b_ref, out_ref, *, weight, threshold):
    img = img_ref[0]          # (Hp, Wp) plane
    a = a_ref[...]            # (Hp, Hp) reflect-blur row operator
    b = b_ref[...]            # (Wp, Wp) reflect-blur column operator

    def blur2d(x):
        # reflect-pad + separable Gaussian == two dense MXU matmuls.
        y = jax.lax.dot(a, x, precision=jax.lax.Precision.HIGHEST,
                        preferred_element_type=jnp.float32)
        return jax.lax.dot(y, b, precision=jax.lax.Precision.HIGHEST,
                           preferred_element_type=jnp.float32)

    blur = blur2d(img)
    residual = img - blur
    mask = (jnp.abs(residual) * 255.0 > threshold).astype(jnp.float32)
    # TODO(synk): on v6e/v7x this second blur could run in bf16 (packed VALU /
    # cheaper MXU passes); kept f32 so v5e works and the threshold stays exact.
    soft = blur2d(mask)
    sharp = jnp.clip(img + weight * residual, 0.0, 1.0)
    out_ref[0] = img + soft * (sharp - img)


# ---------------------------------------------------------------------------
# Wrapper (USMSharp.forward)
# ---------------------------------------------------------------------------
def usm_sharp(img, k1d, weight=0.5, threshold=10.0):
    """img: (B, C, H, W) float32 in [0, 1]; k1d: 1-D Gaussian taps (K,)."""
    B, C, H, W = img.shape
    taps = np.asarray(k1d, dtype=np.float64).reshape(-1)
    K = taps.shape[0]
    pad = K // 2
    if pad >= H or pad >= W:
        raise ValueError(
            f"reflect padding requires H, W > kernel//2 (got H={H}, W={W}, pad={pad})")

    # Sublane/lane-aligned plane so all loads and the output store are dense.
    Hp = _round_up(H, 8)
    Wp = _round_up(W, 128)

    a_full = np.zeros((Hp, Hp), dtype=np.float32)
    a_full[:H, :H] = _reflect_corr_matrix(H, taps, pad)          # rows: A @ x
    b_full = np.zeros((Wp, Wp), dtype=np.float32)
    b_full[:W, :W] = _reflect_corr_matrix(W, taps, pad).T        # cols: x @ B

    BC = B * C
    flat = jnp.pad(img.reshape(BC, H, W).astype(jnp.float32),
                   ((0, 0), (0, Hp - H), (0, Wp - W)))

    kernel = functools.partial(_usm_sharp_kernel,
                               weight=float(weight), threshold=float(threshold))

    plane_bytes = Hp * Wp * 4
    mats_bytes = (Hp * Hp + Wp * Wp) * 4
    # 2x double-buffered in/out plane + resident A/B + ~8 full-plane temporaries.
    working_set = 4 * plane_bytes + 2 * mats_bytes + 8 * plane_bytes + (2 << 20)
    # Size the VMEM budget from the actual tile; stay well under v7x's 64 MiB/TC.
    vmem_limit = int(min(max(working_set, 16 << 20), 48 << 20))
    # TODO(synk): for very large planes (>= ~720p) row-tile with a halo
    # (grid (BC, H/TH), overlapping index_map) so the working set fits v7x VMEM.

    flops = int(BC * 2 * (2 * Hp * Hp * Wp + 2 * Hp * Wp * Wp))
    bytes_accessed = int(BC * 2 * plane_bytes + mats_bytes)

    plane_spec = pl.BlockSpec((1, Hp, Wp), lambda n: (n, 0, 0))
    out = pl.pallas_call(
        kernel,
        out_shape=jax.ShapeDtypeStruct((BC, Hp, Wp), jnp.float32),
        grid_spec=pltpu.PrefetchScalarGridSpec(
            num_scalar_prefetch=0,
            grid=(BC,),
            in_specs=[plane_spec,
                      pl.BlockSpec((Hp, Hp), lambda n: (0, 0)),   # resident A
                      pl.BlockSpec((Wp, Wp), lambda n: (0, 0))],  # resident B
            out_specs=plane_spec),
        compiler_params=pltpu.CompilerParams(
            dimension_semantics=("parallel",),
            vmem_limit_bytes=vmem_limit),
        cost_estimate=pl.CostEstimate(flops=flops, transcendentals=0,
                                      bytes_accessed=bytes_accessed),
    )(flat, jnp.asarray(a_full), jnp.asarray(b_full))
    return out[:, :H, :W].reshape(B, C, H, W)


# ---------------------------------------------------------------------------
# Pure-JAX reference (mirrors the PyTorch filter2D / USMSharp.forward)
# ---------------------------------------------------------------------------
def _filter2d_ref(img, k2d):
    b, c, h, w = img.shape
    K = k2d.shape[-1]
    p = K // 2
    padded = jnp.pad(img, ((0, 0), (0, 0), (p, p), (p, p)), mode="reflect")
    out = jax.lax.conv_general_dilated(
        padded.reshape(b * c, 1, h + 2 * p, w + 2 * p),
        k2d.reshape(1, 1, K, K).astype(jnp.float32),
        window_strides=(1, 1), padding="VALID",
        precision=jax.lax.Precision.HIGHEST)
    return out.reshape(b, c, h, w)


def _usm_sharp_ref(img, k2d, weight=0.5, threshold=10.0):
    blur = _filter2d_ref(img, k2d)
    residual = img - blur
    mask = (jnp.abs(residual) * 255.0 > threshold).astype(jnp.float32)
    soft_mask = _filter2d_ref(mask, k2d)
    sharp = jnp.clip(img + weight * residual, 0.0, 1.0)
    return soft_mask * sharp + (1.0 - soft_mask) * img


if __name__ == "__main__":
    # Default radius=50 (-> 51x51 kernel) cannot reflect-pad a 16x16 image,
    # so use small radii consistent with the module's odd-size semantics.
    k1d, k2d = make_usm_kernels(radius=5, sigma=0)
    img = jax.random.uniform(jax.random.PRNGKey(0), (2, 4, 16, 16), dtype=jnp.float32)
    out = jax.block_until_ready(usm_sharp(img, k1d, weight=0.5, threshold=10.0))
    ref = _usm_sharp_ref(img, k2d, weight=0.5, threshold=10.0)
    np.testing.assert_allclose(np.asarray(out), np.asarray(ref), rtol=1e-5, atol=1e-5)

    # Second config exercises the sublane/lane alignment padding path
    # (H not a multiple of 8, W not a multiple of 128).
    k1d2, k2d2 = make_usm_kernels(radius=7, sigma=0)
    img2 = jax.random.uniform(jax.random.PRNGKey(1), (1, 3, 12, 20), dtype=jnp.float32)
    out2 = jax.block_until_ready(usm_sharp(img2, k1d2, weight=0.5, threshold=10.0))
    ref2 = _usm_sharp_ref(img2, k2d2, weight=0.5, threshold=10.0)
    np.testing.assert_allclose(np.asarray(out2), np.asarray(ref2), rtol=1e-5, atol=1e-5)

    print("KERNEL_OK")
</pallas_src>

<mosaic_0001>
module attributes {stable_mosaic.version = 11 : i64} {
  func.func @_usm_sharp_kernel(%arg0: i32, %arg1: memref<1x16x128xf32, #tpu.memory_space<vmem>>, %arg2: memref<16x16xf32, #tpu.memory_space<vmem>>, %arg3: memref<128x128xf32, #tpu.memory_space<vmem>>, %arg4: memref<1x16x128xf32, #tpu.memory_space<vmem>>) attributes {dimension_semantics = [#tpu.dimension_semantics<parallel>], iteration_bounds = array<i64: 8>, scalar_prefetch = 0 : i64, scratch_operands = 0 : i64, tpu.core_type = #tpu.core_type<tc>, window_params = [{transform_indices = @transform_0, window_bounds = array<i64: 1, 16, 128>}, {pipeline_mode = #tpu.pipeline_mode<synchronous>, transform_indices = @transform_1, window_bounds = array<i64: 16, 16>}, {pipeline_mode = #tpu.pipeline_mode<synchronous>, transform_indices = @transform_2, window_bounds = array<i64: 128, 128>}, {transform_indices = @transform_3, window_bounds = array<i64: 1, 16, 128>}]} {
    %c0 = arith.constant 0 : index
    %c0_0 = arith.constant 0 : index
    %c0_1 = arith.constant 0 : index
    %0 = vector.load %arg1[%c0, %c0_0, %c0_1] : memref<1x16x128xf32, #tpu.memory_space<vmem>>, vector<1x16x128xf32>
    %1 = vector.shape_cast %0 : vector<1x16x128xf32> to vector<16x128xf32>
    %c0_2 = arith.constant 0 : index
    %c0_3 = arith.constant 0 : index
    %2 = vector.load %arg2[%c0_2, %c0_3] : memref<16x16xf32, #tpu.memory_space<vmem>>, vector<16x16xf32>
    %c0_4 = arith.constant 0 : index
    %c0_5 = arith.constant 0 : index
    %3 = vector.load %arg3[%c0_4, %c0_5] : memref<128x128xf32, #tpu.memory_space<vmem>>, vector<128x128xf32>
    %cst = arith.constant dense<0.000000e+00> : vector<16x128xf32>
    %4 = tpu.matmul %2, %1, %cst {dimension_numbers = #tpu.dot_dimension_numbers<[1], [0], [0], [1], [0, 0, 1, 1], [], []>, precision = #tpu.contract_precision<fp32>} : vector<16x16xf32>, vector<16x128xf32>, vector<16x128xf32> -> vector<16x128xf32>
    %cst_6 = arith.constant dense<0.000000e+00> : vector<16x128xf32>
    %5 = tpu.matmul %4, %3, %cst_6 {dimension_numbers = #tpu.dot_dimension_numbers<[1], [0], [0], [1], [0, 0, 1, 1], [], []>, precision = #tpu.contract_precision<fp32>} : vector<16x128xf32>, vector<128x128xf32>, vector<16x128xf32> -> vector<16x128xf32>
    %6 = arith.subf %1, %5 : vector<16x128xf32>
    %7 = math.absf %6 : vector<16x128xf32>
    %cst_7 = arith.constant 2.550000e+02 : f32
    %8 = vector.broadcast %cst_7 : f32 to vector<16x128xf32>
    %9 = arith.mulf %7, %8 : vector<16x128xf32>
    %cst_8 = arith.constant 1.000000e+01 : f32
    %10 = vector.broadcast %cst_8 : f32 to vector<16x128xf32>
    %11 = arith.cmpf ogt, %9, %10 : vector<16x128xf32>
    %12 = arith.extui %11 : vector<16x128xi1> to vector<16x128xi32>
    %13 = arith.sitofp %12 : vector<16x128xi32> to vector<16x128xf32>
    %cst_9 = arith.constant dense<0.000000e+00> : vector<16x128xf32>
    %14 = tpu.matmul %2, %13, %cst_9 {dimension_numbers = #tpu.dot_dimension_numbers<[1], [0], [0], [1], [0, 0, 1, 1], [], []>, precision = #tpu.contract_precision<fp32>} : vector<16x16xf32>, vector<16x128xf32>, vector<16x128xf32> -> vector<16x128xf32>
    %cst_10 = arith.constant dense<0.000000e+00> : vector<16x128xf32>
    %15 = tpu.matmul %14, %3, %cst_10 {dimension_numbers = #tpu.dot_dimension_numbers<[1], [0], [0], [1], [0, 0, 1, 1], [], []>, precision = #tpu.contract_precision<fp32>} : vector<16x128xf32>, vector<128x128xf32>, vector<16x128xf32> -> vector<16x128xf32>
    %cst_11 = arith.constant 5.000000e-01 : f32
    %16 = vector.broadcast %cst_11 : f32 to vector<16x128xf32>
    %17 = arith.mulf %16, %6 : vector<16x128xf32>
    %18 = arith.addf %1, %17 : vector<16x128xf32>
    %cst_12 = arith.constant 0.000000e+00 : f32
    %cst_13 = arith.constant 1.000000e+00 : f32
    %19 = vector.broadcast %cst_12 : f32 to vector<16x128xf32>
    %20 = arith.maximumf %19, %18 : vector<16x128xf32>
    %21 = vector.broadcast %cst_13 : f32 to vector<16x128xf32>
    %22 = arith.minimumf %21, %20 : vector<16x128xf32>
    %23 = arith.subf %22, %1 : vector<16x128xf32>
    %24 = arith.mulf %15, %23 : vector<16x128xf32>
    %25 = arith.addf %1, %24 : vector<16x128xf32>
    %c0_14 = arith.constant 0 : index
    %c0_15 = arith.constant 0 : index
    %c0_16 = arith.constant 0 : index
    %26 = vector.load %arg4[%c0_14, %c0_15, %c0_16] : memref<1x16x128xf32, #tpu.memory_space<vmem>>, vector<1x16x128xf32>
    %27 = vector.shape_cast %26 : vector<1x16x128xf32> to vector<16x128xf32>
    %28 = vector.shape_cast %25 : vector<16x128xf32> to vector<1x16x128xf32>
    tpu.vector_store %arg4[%c0_14, %c0_15, %c0_16], %28 {strides = array<i32>} : memref<1x16x128xf32, #tpu.memory_space<vmem>>, vector<1x16x128xf32>,
    return
  }
  func.func @transform_0(%arg0: i32) -> (i32, i32, i32) {
    %c0_i32 = arith.constant 0 : i32
    %c0_i32_0 = arith.constant 0 : i32
    %c0_i32_1 = arith.constant 0 : i32
    return %arg0, %c0_i32, %c0_i32_0 : i32, i32, i32
  }
  func.func @transform_1(%arg0: i32) -> (i32, i32) {
    %c0_i32 = arith.constant 0 : i32
    %c0_i32_0 = arith.constant 0 : i32
    %c0_i32_1 = arith.constant 0 : i32
    return %c0_i32, %c0_i32_0 : i32, i32
  }
  func.func @transform_2(%arg0: i32) -> (i32, i32) {
    %c0_i32 = arith.constant 0 : i32
    %c0_i32_0 = arith.constant 0 : i32
    %c0_i32_1 = arith.constant 0 : i32
    return %c0_i32, %c0_i32_0 : i32, i32
  }
  func.func @transform_3(%arg0: i32) -> (i32, i32, i32) {
    %c0_i32 = arith.constant 0 : i32
    %c0_i32_0 = arith.constant 0 : i32
    %c0_i32_1 = arith.constant 0 : i32
    return %arg0, %c0_i32, %c0_i32_0 : i32, i32, i32
  }
}

</mosaic_0001>

<bundles_post_ra>
// kernel: tpu_custom_call.1
= control target key start
LH: loop header
LB: loop body
LE: loop exit
PB: predicated region body
PF: predicated region fallthrough
CT: control target
= control target key end

     0   :  { %8 = vsyncpa [#allocation3], 0  ;;  %s2434_s0 = inlined_call_operand.hbm [shape: f32[8,16,128], index: 0, kind: input, shape index: {}]   ;;  %s2435_s1 = inlined_call_operand.hbm [shape: f32[16,16], index: 1, kind: input, shape index: {}]   ;;  %s2436_s2 = inlined_call_operand.hbm [shape: f32[128,128], index: 2, kind: input, shape index: {}]   ;;  %s2437_s3 = inlined_call_operand.hbm [shape: f32[8,16,128], index: 3, kind: output, shape index: {}]  }
   0x1   :  { %10 = vsyncpa [#allocation3 + $0x1], 0 }
   0x2   :  { %11 = vsyncpa [#allocation6], 0 }
   0x3   :  { %12 = vsyncpa [#allocation4], 0 }
   0x4   :  { %14 = vsyncpa [#allocation4 + $0x1], 0  ;;  %s1804_s12 = smov 0   ;;  %s1806_s13 = smov 0  }
   0x5   :  { %s1808_s14 = smov 0   ;;  %s1810_s15 = smov 0  }
   0x6 LB: > { %s1825_s16 = sadd.s32 4294967295, %s1774_s15   ;;  %s1511_s17 = sadd.s32 4294967294, %s1774_s15   ;;  %s1774_s15 = sphi %s1810_s15, %s2545_s15   ;;  %s1770_s14 = sphi %s1808_s14, %s2544_s14   ;;  %s1766_s13 = sphi %s1806_s13, %s2543_s13   ;;  %s1762_s12 = sphi %s1804_s12, %s2542_s12  }
   0x7   : > { %p40_p0 = scmp.ne.s32.totalorder %s1766_s13, %s1762_s12  ;;  %p41_p1 = scmp.eq.s32.totalorder %s1825_s16, 0 }
   0x8   : > { %p106_p2 = scmp.eq.s32.totalorder %s1825_s16, 7  ;;  %p112_p3 = scmp.eq.s32.totalorder %s1511_s17, 7 }
   0x9   : > { %p1834_p4 = por %p41_p1, %p40_p0  ;;  %p1512_p5 = scmp.ge.s32.totalorder %s1774_s15, 1 }
   0xa   : > { %p1839_p6 = por %p112_p3, %p40_p0  ;;  %p119_p7 = scmp.lt.s32.totalorder %s1774_s15, 9 }
   0xb   : > { %s130_s22 = sshll.u32 %s2435_s1, 4  ;;  %s1776_s24 = smov [#allocation5]   ;;  %s131_s22 = int_to_ptr.hbm [resolvable:$true] %s130_s22 }
   0xc   : > { %p1847_p8 = pnand %p1512_p5, %p119_p7  ;;  %s132_s25 = sshll.u32 %s1776_s24, 4  ;;  %s133_s25 = int_to_ptr.vmem [resolvable:$true] %s132_s25 }
   0xd   : > { %s144_s28 = sshll.u32 %s2436_s2, 4  ;;  %s1777_s29 = smov 128   ;;  %s145_s28 = int_to_ptr.hbm [resolvable:$true] %s144_s28 }
   0xe   : > { %p1551_p9 = pneg %p1847_p8  ;;  %s1778_s30 = smov 8  }
   0xf   : > { %s1779_s4 = smov [#allocation7]   ;;  %s1865_s6 = sadd.s32 1, %s1774_s15  }
  0x10   : > { %p1552_p10 = pnand %p1551_p9, %p41_p1  ;;  %s146_s5 = sshll.u32 %s1779_s4, 4  ;;  %s147_s5 = int_to_ptr.vmem [resolvable:$true] %s146_s5 }
  0x11   : > { %s27_s7 = sadd.s32 1, %s1770_s14  ;;  %s24_s8 = ssub.s32 %s1774_s15, %s1865_s6 }
  0x12   : > { %1554 = dma.hbm_to_vmem [thread:$0]  (!%p1552_p10), %s131_s22, 256, %s133_s25, [#allocation6], %s1777_s29, %s1777_s29, %s1778_s30  }
  0x13   : > { %1557 = dma.hbm_to_vmem [thread:$0]  (!%p1552_p10), %s145_s28, 2048, %s147_s5, [#allocation6], %s1777_s29, %s1777_s29, %s1778_s30  }
  0x14   : > { %p34_p11 = scmp.ne.s32.totalorder %s1770_s14, %s1766_s13  ;;  %p25_p12 = scmp.eq.s32.totalorder %s24_s8, 0 }
  0x15   : > { %p35_p13 = scmp.eq.s32.totalorder %s1774_s15, 0  ;;  %p1568_p3 = scmp.lt.s32.totalorder %s1774_s15, 8 }
  0x16   : > { %p1875_p0 = por %p106_p2, %p34_p11  ;;  %s160_s11 = sand.u32 1, %s1770_s14  }
  0x17   : > { %s1881_s10 = scalar_select %p25_p12, %s1770_s14, %s27_s7  }
  0x18   : > { %p36_p5 = por %p35_p13, %p34_p11  ;;  %s1516_s17 = sshll.u32 %s160_s11, 4 }
  0x19   : > { %s1537_s20 = sshll.u32 %s1774_s15, 4  ;;  %s164_s25 = scalar_lea.vmem [#allocation2], %s1516_s17 }
  0x1a   : > { %s169_s24 = scalar_lea.hbm %s2434_s0, %s1537_s20  ;;  %s172_s26 = sshll.u32 %s164_s25, 4  ;;  %s173_s26 = int_to_ptr.vmem [resolvable:$true] %s172_s26 }
  0x1b   : > { %s170_s27 = sshll.u32 %s169_s24, 4  ;;  %p1888_p2 = pnand %p1568_p3, %p36_p5  ;;  %s171_s27 = int_to_ptr.hbm [resolvable:$true] %s170_s27 }
  0x1c   : > { %s161_s4 = scalar_lea.sflag [#allocation3], %s160_s11  ;;  %s1674_s5 = sshra.s32 %s171_s27, 4  ;;  %s1675_s5 = int_to_ptr.hbm [resolvable:$true] %s1674_s5 }
  0x1d   : > { %s1676_s7 = scalar_lea.hbm %s1675_s5, 16  ;;  %p1678_p9 = pneg %p1888_p2 }
  0x1e   : > { %p1677_p7 = scmp.ne.s32.totalorder %s1675_s5, %s1676_s7  ;;  %s1681_s20 = scalar_lea.hbm %s2434_s0, 128 }
  0x1f   : > { %p1682_p12 = scmp.lt.s32.totalorder %s1675_s5, %s2434_s0  ;;  %p1683_p13 = scmp.lt.s32.totalorder %s1681_s20, %s1676_s7 }
  0x20   : > { %p1679_p10 = pnand %p1678_p9, %p1677_p7 }
  0x21   : > { %p1684_p3 = por %p1683_p13, %p1682_p12 }
  0x22   : > { %p1680_p11 = pneg %p1679_p10 }
  0x24   : > { %p1685_p5 = pnand %p1684_p3, %p1680_p11 }
  0x26   : > { %1688 = shalt.err (!%p1685_p5)
}
  0x27   : > { %1561 = dma.hbm_to_vmem [thread:$0]  (!%p1888_p2), %s171_s27, 256, %s173_s26, %s161_s4, %s1777_s29, %s1777_s29, %s1778_s30  }
  0x28   : > { %184 = sbr.rel (%p1847_p8) target bundleno = 729 (0x2d9), region = 32 }
  0x2d   : > { %s1908_s11 = sand.u32 1, %s1766_s13  }
  0x2e   : > { %s1520_s24 = sshll.u32 %s1908_s11, 4  ;;  %s187_s25 = scalar_lea.sflag [#allocation3], %s1908_s11 }
  0x2f   : > { %s1914_s5 = scalar_lea.vmem [#allocation2], %s1520_s24 }
  0x30   : > { %1749 = dma.done.wait (%p1834_p4), %s187_s25, 256  }
  0x31   : > { %1751 = vsyncadd (%p1834_p4), %s187_s25, 4294967040 }
  0x32   : > { %1753 = dma.done.wait (%p41_p1), [#allocation6], 2304  }
  0x33   : > { %1755 = vsyncadd (%p41_p1), [#allocation6], 4294964992  ;;  %vm244_vm0 = vcmask 130048   ;;  %v1925_v0 = vld [vmem:[%s1914_s5 + $0x8] sm:$0xff]  ;;  %v1928_v1 = vld [vmem:[%s1914_s5] sm:$0xff]  ;;  %s1538_s18 = sshll.u32 %s1825_s16, 4 }
  0x34   : > { %v226_v2 = vld [vmem:[#allocation5] sm:$0xff]  ;;  %v1931_v3 = vand.u32 4294901760, %v1925_v0  ;;  %v1934_v4 = vand.u32 4294901760, %v1928_v1  ;;  %v227_v6 = vld [vmem:[#allocation5 + $0x8] sm:$0xff]  ;;  %v241_v19 = vld [vmem:[#allocation7 + $0x68] sm:$0xff]  ;;  %s223_s23 = scalar_lea.vmem [#allocation8], %s1520_s24  ;;  %s1415_s26 = scalar_lea.hbm %s2437_s3, %s1538_s18 }
  0x35   : > { %v246_v5 = vsel %vm244_vm0, %v226_v2, 0  ;;  %v249_v8 = vsel %vm244_vm0, %v227_v6, 0  ;;  %v243_v17 = vld [vmem:[#allocation7 + $0x78] sm:$0xff]  ;;  %v242_v18 = vld [vmem:[#allocation7 + $0x70] sm:$0xff]  ;;  %v240_v24 = vld [vmem:[#allocation7 + $0x60] sm:$0xff]  ;;  %v1967_v27 = vand.u32 4294901760, %v241_v19 }
  0x36   : > { %v1936_v7 = vand.u32 4294901760, %v246_v5  ;;  %266 = vmatpush.msra.mxu2 %v1931_v3  ;;  %v301_v9 = vsub.f32 %v1925_v0, %v1931_v3  ;;  %v307_v10 = vsub.f32 %v1928_v1, %v1934_v4  ;;  %v1943_v11 = vand.u32 4294901760, %v249_v8  ;;  %429 = vmatpush.msra.mxu1 %v1931_v3  ;;  %v239_v29 = vld [vmem:[#allocation7 + $0x58] sm:$0xff]  ;;  %v238_v30 = vld [vmem:[#allocation7 + $0x50] sm:$0xff]  ;;  %v237_v34 = vld [vmem:[#allocation7 + $0x48] sm:$0xff]  ;;  %s1416_s27 = sshll.u32 %s223_s23, 4  ;;  %s1417_s27 = int_to_ptr.vmem [resolvable:$true] %s1416_s27 }
  0x37   : > { %v1961_v23 = vand.u32 4294901760, %v243_v17  ;;  %v1965_v26 = vand.u32 4294901760, %v242_v18  ;;  %v1969_v28 = vand.u32 4294901760, %v240_v24  ;;  %v1982_v37 = vsub.f32 %v241_v19, %v1967_v27  ;;  %v236_v39 = vld [vmem:[#allocation7 + $0x40] sm:$0xff]  ;;  %v235_v48 = vld [vmem:[#allocation7 + $0x38] sm:$0xff]  ;;  %v234_v59 = vld [vmem:[#allocation7 + $0x30] sm:$0xff] }
  0x38   : > { %v1947_v12 = vsub.f32 %v246_v5, %v1936_v7  ;;  %268 = vmatpush.msra.mxu2 %v1934_v4  ;;  %v302_v13 = vand.u32 4294901760, %v301_v9  ;;  %v308_v14 = vand.u32 4294901760, %v307_v10  ;;  %v1951_v15 = vsub.f32 %v249_v8, %v1943_v11  ;;  %431 = vmatpush.msra.mxu1 %v1934_v4  ;;  %s1418_s16 = sshll.u32 %s1415_s26, 4  ;;  %s1404_s28 = scalar_lea.sflag [#allocation4], %s1908_s11  ;;  %s1419_s16 = int_to_ptr.hbm [resolvable:$true] %s1418_s16 }
  0x39   : > { %433 = vmatmul.f32.vlgmr.msra.gmra.mxu1 %v1936_v7  ;;  %v1972_v33 = vsub.f32 %v243_v17, %v1961_v23  ;;  %v1979_v36 = vsub.f32 %v242_v18, %v1965_v26  ;;  %v1985_v38 = vsub.f32 %v240_v24, %v1969_v28  ;;  %v1992_v42 = vand.u32 4294901760, %v239_v29  ;;  %s1718_s4 = sshra.s32 %s1419_s16, 4  ;;  %s1724_s20 = scalar_lea.hbm %s2437_s3, 128  ;;  %s1719_s4 = int_to_ptr.hbm [resolvable:$true] %s1718_s4 }
  0x3a   : > { %v1955_v16 = vand.u32 4294901760, %v1947_v12  ;;  %337 = vmatpush.msrb.mxu2 %v301_v9  ;;  %v303_v20 = vsub.f32 %v301_v9, %v302_v13  ;;  %v309_v21 = vsub.f32 %v307_v10, %v308_v14  ;;  %v1959_v22 = vand.u32 4294901760, %v1951_v15  ;;  %400 = vmatpush.msra.mxu0 %v302_v13  ;;  %s1720_s7 = scalar_lea.hbm %s1719_s4, 16  ;;  %p1725_p2 = scmp.lt.s32.totalorder %s1719_s4, %s2437_s3 }
  0x3b   : > { %655 = vmatpush.msrb.mxu1 %v1961_v23  ;;  %v1990_v41 = vand.u32 4294901760, %v1972_v33  ;;  %v1994_v43 = vand.u32 4294901760, %v238_v30  ;;  %v1999_v44 = vand.u32 4294901760, %v1979_v36  ;;  %v2002_v45 = vand.u32 4294901760, %v1982_v37  ;;  %p1721_p1 = scmp.ne.s32.totalorder %s1719_s4, %s1720_s7  ;;  %p1726_p7 = scmp.lt.s32.totalorder %s1724_s20, %s1720_s7 }
  0x3c   : > { %2476 = vst [vmem:[#allocation12_spill] sm:$0xff] %v1959_v22  ;;  %v272_v25 = vsub.f32 %v1947_v12, %v1955_v16  ;;  %340 = vmatpush.msrb.mxu2 %v307_v10  ;;  %v304_v31 = vand.u32 4294901760, %v303_v20  ;;  %v310_v32 = vand.u32 4294901760, %v309_v21  ;;  %404 = vmatpush.msra.mxu0 %v308_v14  ;;  %v280_v40 = vsub.f32 %v1951_v15, %v1959_v22 }
  0x3d   : > { %406 = vmatmul.f32.vlgmr.msra.gmra.mxu0 %v1936_v7  ;;  %2477 = vst [vmem:[#allocation13_spill] sm:$0xff] %v1999_v44  ;;  %v2005_v46 = vand.u32 4294901760, %v1985_v38  ;;  %v2007_v47 = vand.u32 4294901760, %v237_v34  ;;  %657 = vmatpush.msrb.mxu1 %v1965_v26  ;;  %v493_v49 = vsub.f32 %v1972_v33, %v1990_v41  ;;  %v2014_v50 = vsub.f32 %v239_v29, %v1992_v42  ;;  %p1722_p4 = pnand %p1721_p1, %p1875_p0  ;;  %p1727_p9 = por %p1726_p7, %p1725_p2 }
  0x3e   : > { %v1975_v35 = vand.u32 4294901760, %v272_v25  ;;  %305 = vmatpush.msra.mxu3 %v304_v31  ;;  %597 = vmatpush.msrb.mxu0 %v1972_v33  ;;  %2478 = vst [vmem:[#allocation14_spill] sm:$0xff] %v2002_v45  ;;  %v2017_v51 = vsub.f32 %v238_v30, %v1994_v43  ;;  %v2019_v52 = vand.u32 4294901760, %v236_v39  ;;  %v499_v53 = vsub.f32 %v1979_v36, %v1999_v44 }
  0x3f   : > { %2479 = vst [vmem:[#allocation15_spill] sm:$0xff] %v2005_v46  ;;  %v505_v54 = vsub.f32 %v1982_v37, %v2002_v45  ;;  %v2028_v55 = vand.u32 4294901760, %v493_v49  ;;  %v2031_v56 = vand.u32 4294901760, %v2014_v50  ;;  %v2035_v57 = vsub.f32 %v237_v34, %v2007_v47  ;;  %659 = vmatpush.msrb.mxu1 %v1967_v27  ;;  %p1723_p8 = pneg %p1722_p4 }
  0x40   : > { %274 = vmatmul.f32.vlgmr.msra.gmra.mxu2 %v1975_v35  ;;  %311 = vmatpush.msra.mxu3 %v310_v32  ;;  %v2037_v58 = vand.u32 4294901760, %v235_v48  ;;  %v2039_v60 = vand.u32 4294901760, %v280_v40  ;;  %v2041_v61 = vand.u32 4294901760, %v499_v53  ;;  %v511_v62 = vsub.f32 %v1985_v38, %v2005_v46 }
  0x41   : > { %442 = vmatpush.msra.mxu2 %v1961_v23  ;;  %313 = vmatmul.f32.vlgmr.msra.gmra.mxu3 %v1936_v7  ;;  %2480 = vst [vmem:[#allocation16_spill] sm:$0xff] %v2031_v56  ;;  %v2049_v63 = vand.u32 4294901760, %v2017_v51  ;;  %v2053_v2 = vsub.f32 %v236_v39, %v2019_v52  ;;  %v2059_v5 = vand.u32 4294901760, %v505_v54  ;;  %v2064_v6 = vand.u32 4294901760, %v2035_v57  ;;  %v233_v39 = vld [vmem:[#allocation7 + $0x28] sm:$0xff]  ;;  %v231_v54 = vld [vmem:[#allocation7 + $0x18] sm:$0xff]  ;;  %p1728_p10 = pnand %p1727_p9, %p1723_p8 }
  0x42   : > { %437 = vmatmul.f32.gmra.mxu1 %v1943_v11  ;;  %367 = vmatpush.msrb.mxu3 %v1931_v3  ;;  %v2057_v3 = vand.u32 4294901760, %v234_v59  ;;  %v2068_v8 = vsub.f32 %v235_v48, %v2037_v58  ;;  %v2073_v9 = vand.u32 4294901760, %v511_v62  ;;  %v2142_v40 = vand.u32 4294901760, %v233_v39  ;;  %v232_v48 = vld [vmem:[#allocation7 + $0x20] sm:$0xff] }
  0x43   : > { %444 = vmatpush.msra.mxu2 %v1965_v26  ;;  %600 = vmatpush.msrb.mxu0 %v1979_v36  ;;  %2481 = vst [vmem:[#allocation17_spill] sm:$0xff] %v2049_v63  ;;  %v523_v10 = vsub.f32 %v2017_v51, %v2049_v63  ;;  %v2078_v13 = vand.u32 4294901760, %v2053_v2  ;;  %v529_v18 = vsub.f32 %v2035_v57, %v2064_v6  ;;  %v2147_v53 = vand.u32 4294901760, %v232_v48 }
  0x44   : > { %369 = vmatpush.msrb.mxu3 %v1934_v4  ;;  %v517_v4 = vsub.f32 %v2014_v50, %v2031_v56  ;;  %2482 = vst [vmem:[#allocation18_spill] sm:$0xff] %v2064_v6  ;;  %v2082_v14 = vsub.f32 %v234_v59, %v2057_v3  ;;  %661 = vmatpush.msrb.mxu1 %v1969_v28  ;;  %v2093_v19 = vand.u32 4294901760, %v2068_v8 }
  0x45   : > { %446 = vmatpush.msra.mxu2 %v1967_v27  ;;  %410 = vmatmul.f32.gmra.mxu0 %v1943_v11  ;;  %2483 = vst [vmem:[#allocation19_spill] sm:$0xff] %v2068_v8  ;;  %v2099_v20 = vand.u32 4294901760, %v523_v10  ;;  %v535_v21 = vsub.f32 %v2053_v2, %v2078_v13  ;;  %v2110_v25 = vand.u32 4294901760, %v529_v18  ;;  %v2145_v49 = vsub.f32 %v233_v39, %v2142_v40  ;;  %v230_v10 = vld [vmem:[#allocation7 + $0x10] sm:$0xff]  ;;  %v229_v39 = vld [vmem:[#allocation7 + $0x8] sm:$0xff] }
  0x46   : > { %495 = vmatpush.msra.mxu3 %v2028_v55  ;;  %603 = vmatpush.msrb.mxu0 %v1982_v37  ;;  %2484 = vst [vmem:[#allocation20_spill] sm:$0xff] %v2078_v13  ;;  %v2088_v17 = vand.u32 4294901760, %v517_v4  ;;  %v2104_v24 = vand.u32 4294901760, %v2082_v14  ;;  %v541_v29 = vsub.f32 %v2068_v8, %v2093_v19  ;;  %v2155_v62 = vsub.f32 %v232_v48, %v2147_v53 }
  0x47   : > { %448 = vmatpush.msra.mxu2 %v1969_v28  ;;  %2485 = vst [vmem:[#allocation21_spill] sm:$0xff] %v2082_v14  ;;  %663 = vmatpush.msrb.mxu1 %v1992_v42  ;;  %v2118_v30 = vand.u32 4294901760, %v535_v21  ;;  %v2152_v59 = vand.u32 4294901760, %v2145_v49  ;;  %v2157_v4 = vand.u32 4294901760, %v231_v54 }
  0x48   : > { %282 = vmatmul.f32.gmra.mxu2 %v2039_v60  ;;  %501 = vmatpush.msra.mxu3 %v2041_v61  ;;  %2486 = vst [vmem:[#allocation22_spill] sm:$0xff] %v2093_v19  ;;  %v547_v31 = vsub.f32 %v2082_v14, %v2104_v24  ;;  %v2126_v32 = vand.u32 4294901760, %v541_v29  ;;  %v2165_v21 = vand.u32 4294901760, %v2155_v62 }
  0x49   : > { %450 = vmatpush.msra.mxu2 %v1992_v42  ;;  %606 = vmatpush.msrb.mxu0 %v1985_v38  ;;  %2487 = vst [vmem:[#allocation23_spill] sm:$0xff] %v2104_v24  ;;  %v553_v18 = vsub.f32 %v2145_v49, %v2152_v59  ;;  %v2168_v29 = vsub.f32 %v231_v54, %v2157_v4 }
  0x4a   : > { %317 = vmatmul.f32.gmra.mxu3 %v1943_v11  ;;  %665 = vmatpush.msrb.mxu1 %v1994_v43  ;;  %2488 = vst [vmem:[#allocation24_spill] sm:$0xff] %v2118_v30  ;;  %v2132_v34 = vand.u32 4294901760, %v547_v31  ;;  %v2170_v31 = vand.u32 4294901760, %v230_v10 }
  0x4b   : > { %507 = vmatpush.msra.mxu3 %v2059_v5  ;;  %452 = vmatpush.msra.mxu2 %v1994_v43  ;;  %2489 = vst [vmem:[#allocation25_spill] sm:$0xff] %v2126_v32  ;;  %v2175_v48 = vand.u32 4294901760, %v553_v18 }
  0x4c   : > { %609 = vmatpush.msrb.mxu0 %v2014_v50  ;;  %667 = vmatpush.msrb.mxu1 %v2007_v47  ;;  %2490 = vst [vmem:[#allocation26_spill] sm:$0xff] %v2132_v34  ;;  %v2183_v54 = vsub.f32 %v230_v10, %v2170_v31 }
  0x4d   : > { %513 = vmatpush.msra.mxu3 %v2073_v9  ;;  %454 = vmatpush.msra.mxu2 %v2007_v47  ;;  %2491 = vst [vmem:[#allocation27_spill] sm:$0xff] %v2145_v49 }
  0x4e   : > { %612 = vmatpush.msrb.mxu0 %v2017_v51  ;;  %669 = vmatpush.msrb.mxu1 %v2019_v52  ;;  %2492 = vst [vmem:[#allocation28_spill] sm:$0xff] %v2152_v59 }
  0x4f   : > { %519 = vmatpush.msra.mxu3 %v2088_v17  ;;  %456 = vmatpush.msra.mxu2 %v2019_v52  ;;  %2493 = vst [vmem:[#allocation29_spill] sm:$0xff] %v2155_v62 }
  0x50   : > { %343 = vmatmul.f32.vlgmr.msrb.gmra.mxu2 %v1947_v12  ;;  %615 = vmatpush.msrb.mxu0 %v2035_v57  ;;  %2494 = vst [vmem:[#allocation30_spill] sm:$0xff] %v2165_v21 }
  0x51   : > { %525 = vmatpush.msra.mxu3 %v2099_v20  ;;  %458 = vmatpush.msra.mxu2 %v2037_v58  ;;  %2495 = vst [vmem:[#allocation31_spill] sm:$0xff] %v2168_v29 }
  0x52   : > { %373 = vmatmul.f32.vlgmr.msrb.gmra.mxu3 %v1955_v16  ;;  %618 = vmatpush.msrb.mxu0 %v2053_v2  ;;  %2496 = vst [vmem:[#allocation32_spill] sm:$0xff] %v2175_v48 }
  0x53   : > { %531 = vmatpush.msra.mxu3 %v2110_v25  ;;  %460 = vmatpush.msra.mxu2 %v2057_v3  ;;  %2498 = vst [vmem:[#allocation34_spill] sm:$0xff] %v2183_v54 }
  0x54   : > { %621 = vmatpush.msrb.mxu0 %v2068_v8  ;;  %671 = vmatpush.msrb.mxu1 %v2037_v58 }
  0x55   : > { %537 = vmatpush.msra.mxu3 %v2118_v30  ;;  %462 = vmatpush.msra.mxu2 %v2142_v40 }
  0x56   : > { %624 = vmatpush.msrb.mxu0 %v2082_v14  ;;  %673 = vmatpush.msrb.mxu1 %v2057_v3  ;;  %v228_v14 = vld [vmem:[#allocation7] sm:$0xff] }
  0x57   : > { %543 = vmatpush.msra.mxu3 %v2126_v32  ;;  %464 = vmatpush.msra.mxu2 %v2147_v53  ;;  %v2196_v32 = vand.u32 4294901760, %v2183_v54  ;;  %v2198_v10 = vand.u32 4294901760, %v228_v14 }
  0x58   : > { %348 = vmatmul.f32.gmra.mxu2 %v1951_v15  ;;  %675 = vmatpush.msrb.mxu1 %v2142_v40 }
  0x59   : > { %549 = vmatpush.msra.mxu3 %v2132_v34  ;;  %627 = vmatpush.msrb.mxu0 %v2145_v49  ;;  %v559_v49 = vsub.f32 %v2155_v62, %v2165_v21  ;;  %v2187_v34 = vand.u32 4294901760, %v229_v39  ;;  %2500 = vst [vmem:[#allocation36_spill] sm:$0xff] %v2196_v32 }
  0x5a   : > { %379 = vmatmul.f32.gmra.mxu3 %v1959_v22  ;;  %677 = vmatpush.msrb.mxu1 %v2147_v53  ;;  %v2180_v22 = vand.u32 4294901760, %v2168_v29 }
  0x5b   : > { %466 = vmatpush.msra.mxu2 %v2157_v4  ;;  %630 = vmatpush.msrb.mxu0 %v2155_v62  ;;  %v2191_v18 = vand.u32 4294901760, %v559_v49  ;;  %v2202_v8 = vsub.f32 %v229_v39, %v2187_v34 }
  0x5c   : > { %679 = vmatpush.msrb.mxu1 %v2157_v4  ;;  %2497 = vst [vmem:[#allocation33_spill] sm:$0xff] %v2180_v22  ;;  %555 = vmatpush.msra.mxu3 %v2175_v48  ;;  %v565_v62 = vsub.f32 %v2168_v29, %v2180_v22  ;;  %v2212_v48 = vsub.f32 %v228_v14, %v2198_v10 }
  0x5d   : > { %468 = vmatpush.msra.mxu2 %v2170_v31  ;;  %633 = vmatpush.msrb.mxu0 %v2168_v29  ;;  %2499 = vst [vmem:[#allocation35_spill] sm:$0xff] %v2191_v18  ;;  %v571_v29 = vsub.f32 %v2183_v54, %v2196_v32  ;;  %v2215_v30 = vand.u32 4294901760, %v2202_v8 }
  0x5e   : > { %681 = vmatpush.msrb.mxu1 %v2170_v31  ;;  %2501 = vst [vmem:[#allocation37_spill] sm:$0xff] %v2202_v8  ;;  %561 = vmatpush.msra.mxu3 %v2191_v18  ;;  %v2207_v49 = vand.u32 4294901760, %v565_v62  ;;  %v2223_v62 = vand.u32 4294901760, %v2212_v48 }
  0x5f   : > { %636 = vmatpush.msrb.mxu0 %v2183_v54  ;;  %470 = vmatpush.msra.mxu2 %v2187_v34  ;;  %2503 = vst [vmem:[#allocation39_spill] sm:$0xff] %v2212_v48  ;;  %v2220_v39 = vand.u32 4294901760, %v571_v29  ;;  %v577_v14 = vsub.f32 %v2202_v8, %v2215_v30 }
  0x60   : > { %683 = vmatpush.msrb.mxu1 %v2187_v34  ;;  %2502 = vst [vmem:[#allocation38_spill] sm:$0xff] %v2207_v49  ;;  %567 = vmatpush.msra.mxu3 %v2207_v49  ;;  %v583_v54 = vsub.f32 %v2212_v48, %v2223_v62 }
  0x61   : > { %2504 = vst [vmem:[#allocation40_spill] sm:$0xff] %v2215_v30  ;;  %472 = vmatpush.msra.mxu2 %v2198_v10  ;;  %639 = vmatpush.msrb.mxu0 %v2202_v8  ;;  %v2234_v29 = vand.u32 4294901760, %v577_v14 }
  0x62   : > { %2505 = vst [vmem:[#allocation41_spill] sm:$0xff] %v2220_v39  ;;  %685 = vmatpush.msrb.mxu1 %v2198_v10  ;;  %573 = vmatpush.msra.mxu3 %v2220_v39  ;;  %v2236_v49 = vand.u32 4294901760, %v583_v54 }
  0x63   : > { %2506 = vst [vmem:[#allocation42_spill] sm:$0xff] %v2223_v62  ;;  %702 = vmatpush.msrb.mxu2 %v1990_v41  ;;  %642 = vmatpush.msrb.mxu0 %v2212_v48 }
  0x64   : > { %2507 = vst [vmem:[#allocation43_spill] sm:$0xff] %v2234_v29  ;;  %579 = vmatpush.msra.mxu3 %v2234_v29 }
  0x65   : > { %706 = vmatpush.msrb.mxu2 %v1999_v44  ;;  %2508 = vst [vmem:[#allocation44_spill] sm:$0xff] %v2236_v49 }
  0x66   : > { %585 = vmatpush.msra.mxu3 %v2236_v49 }
  0x67   : > { %710 = vmatpush.msrb.mxu2 %v2002_v45 }
  0x68   : > { %773 = vmatpush.msrb.mxu3 %v1961_v23 }
  0x69   : > { %714 = vmatpush.msrb.mxu2 %v2005_v46 }
  0x6a   : > { %775 = vmatpush.msrb.mxu3 %v1965_v26 }
  0x6b   : > { %718 = vmatpush.msrb.mxu2 %v2031_v56 }
  0x6c   : > { %777 = vmatpush.msrb.mxu3 %v1967_v27 }
  0x6d   : > { %722 = vmatpush.msrb.mxu2 %v2049_v63 }
  0x6e   : > { %779 = vmatpush.msrb.mxu3 %v1969_v28 }
  0x6f   : > { %726 = vmatpush.msrb.mxu2 %v2064_v6 }
  0x70   : > { %781 = vmatpush.msrb.mxu3 %v1992_v42 }
  0x71   : > { %730 = vmatpush.msrb.mxu2 %v2078_v13 }
  0x72   : > { %783 = vmatpush.msrb.mxu3 %v1994_v43 }
  0x73   : > { %734 = vmatpush.msrb.mxu2 %v2093_v19 }
  0x74   : > { %785 = vmatpush.msrb.mxu3 %v2007_v47 }
  0x75   : > { %738 = vmatpush.msrb.mxu2 %v2104_v24 }
  0x76   : > { %787 = vmatpush.msrb.mxu3 %v2019_v52 }
  0x77   : > { %742 = vmatpush.msrb.mxu2 %v2152_v59 }
  0x78   : > { %789 = vmatpush.msrb.mxu3 %v2037_v58 }
  0x79   : > { %746 = vmatpush.msrb.mxu2 %v2165_v21 }
  0x7a   : > { %791 = vmatpush.msrb.mxu3 %v2057_v3 }
  0x7b   : > { %750 = vmatpush.msrb.mxu2 %v2180_v22 }
  0x7c   : > { %793 = vmatpush.msrb.mxu3 %v2142_v40 }
  0x7d   : > { %754 = vmatpush.msrb.mxu2 %v2196_v32 }
  0x7e   : > { %795 = vmatpush.msrb.mxu3 %v2147_v53 }
  0x7f   : > { %758 = vmatpush.msrb.mxu2 %v2215_v30 }
  0x80   : > { %797 = vmatpush.msrb.mxu3 %v2157_v4 }
  0x81   : > { %762 = vmatpush.msrb.mxu2 %v2223_v62 }
  0x82   : > { %799 = vmatpush.msrb.mxu3 %v2170_v31 }
  0x84   : > { %801 = vmatpush.msrb.mxu3 %v2187_v34 }
  0x86   : > { %803 = vmatpush.msrb.mxu3 %v2198_v10 }
  0xb6   : > { %v434_v13 = vpop.f32.mrf.mxu1 }
  0xba   : > { %v407_v24 = vpop.f32.mrf.mxu0 }
  0xbf   : > { %v438_v44 = vpop.f32.mrf.mxu1 }
  0xc2   : > { %v411_v8 = vpop.f32.mrf.mxu0 }
  0xc3   : > { %v275_v54 = vpop.f32.mrf.mxu2 }
  0xc4   : > { %v314_v14 = vpop.f32.mrf.mxu3 }
  0xc5   : > { %v315_v32 = vadd.f32 %v314_v14, %v275_v54 }
  0xcb   : > { %v283_v21 = vpop.f32.mrf.mxu2 }
  0xcd   : > { %v318_v22 = vpop.f32.mrf.mxu3 }
  0xce   : > { %v319_v49 = vadd.f32 %v318_v22, %v283_v21 }
  0xd3   : > { %v344_v59 = vpop.f32.mrf.mxu2 }
  0xd4   : > { %v345_v19 = vadd.f32 %v344_v59, %v315_v32 }
  0xd5   : > { %v374_v30 = vpop.f32.mrf.mxu3 }
  0xd6   : > { %v375_v6 = vadd.f32 %v374_v30, %v345_v19 }
  0xd8   : > { %v408_v63 = vadd.f32 %v407_v24, %v375_v6 }
  0xda   : > { %v435_v62 = vadd.f32 %v434_v13, %v408_v63 }
  0xdb   : > { %v349_v56 = vpop.f32.mrf.mxu2 }
  0xdc   : > { %v473_v48 = vand.u32 4294901760, %v435_v62  ;;  %v350_v29 = vadd.f32 %v349_v56, %v319_v49 }
  0xdd   : > { %v380_v46 = vpop.f32.mrf.mxu3 }
  0xde   : > { %v474_v39 = vsub.f32 %v435_v62, %v473_v48  ;;  %v381_v45 = vadd.f32 %v380_v46, %v350_v29  ;;  %587 = vmatmul.f32.vlgmr.msra.gmra.mxu3 %v473_v48 }
  0xe0   : > { %v412_v18 = vadd.f32 %v411_v8, %v381_v45  ;;  %645 = vmatmul.f32.vlgmr.msrb.gmra.mxu0 %v474_v39  ;;  %v475_v54 = vand.u32 4294901760, %v474_v39 }
  0xe2   : > { %v439_v14 = vadd.f32 %v438_v44, %v412_v18  ;;  %v476_v32 = vsub.f32 %v474_v39, %v475_v54  ;;  %689 = vmatmul.f32.vlgmr.msrb.gmra.mxu1 %v475_v54 }
  0xe4   : > { %v481_v59 = vand.u32 4294901760, %v439_v14  ;;  %v477_v19 = vand.u32 4294901760, %v476_v32 }
  0xe6   : > { %v482_v6 = vsub.f32 %v439_v14, %v481_v59  ;;  %478 = vmatmul.f32.vlgmr.msra.gmra.mxu2 %v477_v19  ;;  %591 = vmatmul.f32.gmra.mxu3 %v481_v59 }
  0xe8   : > { %650 = vmatmul.f32.gmra.mxu0 %v482_v6  ;;  %v483_v22 = vand.u32 4294901760, %v482_v6 }
  0xea   : > { %695 = vmatmul.f32.gmra.mxu1 %v483_v22  ;;  %v484_v56 = vsub.f32 %v482_v6, %v483_v22 }
  0xec   : > { %v485_v63 = vand.u32 4294901760, %v484_v56 }
  0xee   : > { %486 = vmatmul.f32.gmra.mxu2 %v485_v63  ;;  %805 = vmatmul.f32.vlgmr.msrb.gmra.mxu3 %v473_v48 }
  0xf6   : > { %764 = vmatmul.f32.vlgmr.msrb.gmra.mxu2 %v473_v48  ;;  %809 = vmatmul.f32.gmra.mxu3 %v481_v59 }
  0xfe   : > { %768 = vmatmul.f32.gmra.mxu2 %v481_v59 }
 0x15d   : > { %v646_v13 = vpop.f32.mrf.mxu0 }
 0x15f   : > { %v690_v21 = vpop.f32.mrf.mxu1 }
 0x161   : > { %v588_v45 = vpop.f32.mrf.mxu3 }
 0x165   : > { %v651_v54 = vpop.f32.mrf.mxu0 }
 0x167   : > { %v696_v59 = vpop.f32.mrf.mxu1 }
 0x169   : > { %v479_v46 = vpop.f32.mrf.mxu2  ;;  %v592_v44 = vpop.f32.mrf.mxu3 }
 0x16a   : > { %v589_v8 = vadd.f32 %v588_v45, %v479_v46 }
 0x16c   : > { %v647_v30 = vadd.f32 %v646_v13, %v589_v8  ;;  %v1780_v8 = vmov 0.0  }
 0x16e   : > { %v691_v49 = vadd.f32 %v690_v21, %v647_v30 }
 0x171   : > { %v487_v24 = vpop.f32.mrf.mxu2  ;;  %v806_v39 = vpop.f32.mrf.mxu3 }
 0x172   : > { %v593_v18 = vadd.f32 %v592_v44, %v487_v24 }
 0x174   : > { %v652_v14 = vadd.f32 %v651_v54, %v593_v18  ;;  %v1781_v18 = vmov 1.0  }
 0x176   : > { %v697_v19 = vadd.f32 %v696_v59, %v652_v14 }
 0x179   : > { %v765_v62 = vpop.f32.mrf.mxu2  ;;  %v810_v45 = vpop.f32.mrf.mxu3 }
 0x17a   : > { %v766_v29 = vadd.f32 %v765_v62, %v691_v49 }
 0x17c   : > { %v807_v32 = vadd.f32 %v806_v39, %v766_v29 }
 0x17e   : > { %v2271_v48 = vsub.f32 %v1928_v1, %v807_v32 }
 0x180   : > { %v815_v6 = vand.u32 2147483647, %v2271_v48 }
 0x181   : > { %v769_v22 = vpop.f32.mrf.mxu2 }
 0x182   : > { %v770_v56 = vadd.f32 %v769_v22, %v697_v19  ;;  %v817_v63 = vmul.f32 255.0, %v815_v6  ;;  %v2532_v19 = vld [vmem:[#allocation18_spill] sm:$0xff]  ;;  %v2533_v6 = vld [vmem:[#allocation20_spill] sm:$0xff] }
 0x183   : > { %v2534_v22 = vld [vmem:[#allocation22_spill] sm:$0xff] }
 0x184   : > { %v811_v46 = vadd.f32 %v810_v45, %v770_v56  ;;  %vm819_vm1 = vcmp.gt.f32.partialorder %v817_v63, 10.0  ;;  %v2535_v56 = vld [vmem:[#allocation23_spill] sm:$0xff] }
 0x185   : > { %v1524_v13 = vsel %vm819_vm1, 1.0, %v1780_v8 }
 0x186   : > { %v2275_v44 = vsub.f32 %v1925_v0, %v811_v46  ;;  %v881_v21 = vsub.f32 %v1524_v13, %v1524_v13 }
 0x188   : > { %v816_v24 = vand.u32 2147483647, %v2275_v44  ;;  %v882_v62 = vand.u32 4294901760, %v881_v21 }
 0x18a   : > { %v818_v30 = vmul.f32 255.0, %v816_v24  ;;  %v883_v14 = vsub.f32 %v881_v21, %v882_v62 }
 0x18c   : > { %vm820_vm2 = vcmp.gt.f32.partialorder %v818_v30, 10.0  ;;  %v884_v59 = vand.u32 4294901760, %v883_v14 }
 0x18d   : > { %1526 = vmatpush.msk.msra.mxu0 %vm820_vm2, %v1781_v18  ;;  %1530 = vmatpush.msk.msra.mxu3 %vm820_vm2, %v1781_v18  ;;  %v1525_v49 = vsel %vm820_vm2, 1.0, %v1780_v8 }
 0x18e   : > { %v875_v39 = vsub.f32 %v1525_v49, %v1525_v49 }
 0x18f   : > { %1527 = vmatpush.msk.msra.mxu0 %vm819_vm1, %v1781_v18  ;;  %1531 = vmatpush.msk.msra.mxu3 %vm819_vm1, %v1781_v18 }
 0x190   : > { %v876_v29 = vand.u32 4294901760, %v875_v39  ;;  %1007 = vmatmul.f32.vlgmr.msra.gmra.mxu3 %v1936_v7  ;;  %848 = vmatmul.f32.vlgmr.msra.gmra.mxu0 %v1975_v35  ;;  %v2515_v35 = vld [vmem:[#allocation27_spill] sm:$0xff] }
 0x191   : > { %911 = vmatpush.msrb.mxu0 %v875_v39  ;;  %1229 = vmatpush.msrb.mxu3 %v1961_v23 }
 0x192   : > { %974 = vmatpush.msra.mxu2 %v876_v29  ;;  %v877_v54 = vsub.f32 %v875_v39, %v876_v29 }
 0x193   : > { %914 = vmatpush.msrb.mxu0 %v881_v21  ;;  %1231 = vmatpush.msrb.mxu3 %v1965_v26 }
 0x194   : > { %978 = vmatpush.msra.mxu2 %v882_v62  ;;  %v878_v32 = vand.u32 4294901760, %v877_v54 }
 0x195   : > { %1016 = vmatpush.msra.mxu0 %v1961_v23  ;;  %980 = vmatmul.f32.vlgmr.msra.gmra.mxu2 %v1936_v7 }
 0x196   : > { %879 = vmatpush.msra.mxu1 %v878_v32  ;;  %1171 = vmatpush.msrb.mxu2 %v1972_v33  ;;  %v2514_v33 = vld [vmem:[#allocation12_spill] sm:$0xff] }
 0x197   : > { %1018 = vmatpush.msra.mxu0 %v1965_v26  ;;  %1233 = vmatpush.msrb.mxu3 %v1967_v27 }
 0x198   : > { %885 = vmatpush.msra.mxu1 %v884_v59  ;;  %1011 = vmatmul.f32.gmra.mxu3 %v1943_v11 }
 0x199   : > { %1020 = vmatpush.msra.mxu0 %v1967_v27  ;;  %887 = vmatmul.f32.vlgmr.msra.gmra.mxu1 %v1936_v7  ;;  %v2509_v7 = vld [vmem:[#allocation24_spill] sm:$0xff] }
 0x19a   : > { %856 = vmatmul.f32.gmra.mxu0 %v2039_v60  ;;  %1528 = vmatpush.msk.msrb.mxu1 %vm820_vm2, %v1781_v18  ;;  %v2523_v60 = vld [vmem:[#allocation14_spill] sm:$0xff] }
 0x19b   : > { %1022 = vmatpush.msra.mxu0 %v1969_v28  ;;  %1174 = vmatpush.msrb.mxu2 %v1979_v36  ;;  %v2516_v36 = vld [vmem:[#allocation32_spill] sm:$0xff] }
 0x19c   : > { %1235 = vmatpush.msrb.mxu3 %v1969_v28  ;;  %1529 = vmatpush.msk.msrb.mxu1 %vm819_vm1, %v1781_v18 }
 0x19d   : > { %1024 = vmatpush.msra.mxu0 %v1992_v42  ;;  %984 = vmatmul.f32.gmra.mxu2 %v1943_v11 }
 0x19e   : > { %1069 = vmatpush.msra.mxu1 %v2028_v55  ;;  %1177 = vmatpush.msrb.mxu2 %v1982_v37  ;;  %v2517_v37 = vld [vmem:[#allocation29_spill] sm:$0xff]  ;;  %v2521_v55 = vld [vmem:[#allocation38_spill] sm:$0xff] }
 0x19f   : > { %1026 = vmatpush.msra.mxu0 %v1994_v43  ;;  %1237 = vmatpush.msrb.mxu3 %v1992_v42 }
 0x1a0   : > { %1075 = vmatpush.msra.mxu1 %v2041_v61  ;;  %1180 = vmatpush.msrb.mxu2 %v1985_v38  ;;  %v2518_v38 = vld [vmem:[#allocation35_spill] sm:$0xff]  ;;  %v2524_v61 = vld [vmem:[#allocation41_spill] sm:$0xff] }
 0x1a1   : > { %1028 = vmatpush.msra.mxu0 %v2007_v47  ;;  %891 = vmatmul.f32.gmra.mxu1 %v1943_v11  ;;  %v2510_v11 = vld [vmem:[#allocation19_spill] sm:$0xff] }
 0x1a2   : > { %917 = vmatmul.f32.vlgmr.msrb.gmra.mxu0 %v1947_v12  ;;  %1081 = vmatpush.msra.mxu1 %v2059_v5  ;;  %v2511_v12 = vld [vmem:[#allocation25_spill] sm:$0xff]  ;;  %v2527_v5 = vld [vmem:[#allocation43_spill] sm:$0xff] }
 0x1a3   : > { %1030 = vmatpush.msra.mxu0 %v2019_v52  ;;  %1183 = vmatpush.msrb.mxu2 %v2014_v50  ;;  %v2519_v50 = vld [vmem:[#allocation31_spill] sm:$0xff] }
 0x1a4   : > { %1239 = vmatpush.msrb.mxu3 %v1994_v43  ;;  %1087 = vmatpush.msra.mxu1 %v2073_v9  ;;  %v2528_v9 = vld [vmem:[#allocation39_spill] sm:$0xff] }
 0x1a5   : > { %1032 = vmatpush.msra.mxu0 %v2037_v58  ;;  %1186 = vmatpush.msrb.mxu2 %v2017_v51  ;;  %v2520_v51 = vld [vmem:[#allocation13_spill] sm:$0xff] }
 0x1a6   : > { %1241 = vmatpush.msrb.mxu3 %v2007_v47  ;;  %1093 = vmatpush.msra.mxu1 %v2088_v17  ;;  %v2529_v17 = vld [vmem:[#allocation16_spill] sm:$0xff] }
 0x1a7   : > { %1034 = vmatpush.msra.mxu0 %v2057_v3  ;;  %1189 = vmatpush.msrb.mxu2 %v2035_v57  ;;  %v2522_v57 = vld [vmem:[#allocation34_spill] sm:$0xff] }
 0x1a8   : > { %1243 = vmatpush.msrb.mxu3 %v2019_v52  ;;  %1099 = vmatpush.msra.mxu1 %v2099_v20  ;;  %v2530_v20 = vld [vmem:[#allocation44_spill] sm:$0xff] }
 0x1a9   : > { %1036 = vmatpush.msra.mxu0 %v2142_v40  ;;  %947 = vmatmul.f32.vlgmr.msrb.gmra.mxu1 %v1955_v16  ;;  %v2513_v16 = vld [vmem:[#allocation26_spill] sm:$0xff] }
 0x1aa   : > { %922 = vmatmul.f32.gmra.mxu0 %v1951_v15  ;;  %1105 = vmatpush.msra.mxu1 %v2110_v25  ;;  %v2512_v15 = vld [vmem:[#allocation21_spill] sm:$0xff] }
 0x1ab   : > { %1038 = vmatpush.msra.mxu0 %v2147_v53  ;;  %1192 = vmatpush.msrb.mxu2 %v2053_v2  ;;  %v2526_v2 = vld [vmem:[#allocation15_spill] sm:$0xff]  ;;  %v2531_v25 = vld [vmem:[#allocation17_spill] sm:$0xff] }
 0x1ac   : > { %1245 = vmatpush.msrb.mxu3 %v2037_v58  ;;  %1111 = vmatpush.msra.mxu1 %v2509_v7 }
 0x1ad   : > { %1040 = vmatpush.msra.mxu0 %v2157_v4  ;;  %1195 = vmatpush.msrb.mxu2 %v2510_v11 }
 0x1ae   : > { %1247 = vmatpush.msrb.mxu3 %v2057_v3  ;;  %1117 = vmatpush.msra.mxu1 %v2511_v12 }
 0x1af   : > { %1042 = vmatpush.msra.mxu0 %v2170_v31  ;;  %1198 = vmatpush.msrb.mxu2 %v2512_v15 }
 0x1b0   : > { %1249 = vmatpush.msrb.mxu3 %v2142_v40  ;;  %1123 = vmatpush.msra.mxu1 %v2513_v16 }
 0x1b1   : > { %1044 = vmatpush.msra.mxu0 %v2187_v34  ;;  %953 = vmatmul.f32.gmra.mxu1 %v2514_v33 }
 0x1b2   : > { %1201 = vmatpush.msrb.mxu2 %v2515_v35  ;;  %1129 = vmatpush.msra.mxu1 %v2516_v36  ;;  %v1387_v36 = vmul.f32 0.5, %v2271_v48 }
 0x1b3   : > { %1046 = vmatpush.msra.mxu0 %v2198_v10  ;;  %1251 = vmatpush.msrb.mxu3 %v2147_v53 }
 0x1b4   : > { %1204 = vmatpush.msrb.mxu2 %v2517_v37  ;;  %1135 = vmatpush.msra.mxu1 %v2518_v38  ;;  %v1389_v38 = vadd.f32 %v1387_v36, %v1928_v1 }
 0x1b5   : > { %1276 = vmatpush.msrb.mxu0 %v1990_v41  ;;  %1253 = vmatpush.msrb.mxu3 %v2157_v4  ;;  %v2525_v41 = vld [vmem:[#allocation37_spill] sm:$0xff] }
 0x1b6   : > { %1207 = vmatpush.msrb.mxu2 %v2519_v50  ;;  %1141 = vmatpush.msra.mxu1 %v2521_v55 }
 0x1b7   : > { %1280 = vmatpush.msrb.mxu0 %v2520_v51  ;;  %1255 = vmatpush.msrb.mxu3 %v2170_v31 }
 0x1b8   : > { %1210 = vmatpush.msrb.mxu2 %v2522_v57  ;;  %1147 = vmatpush.msra.mxu1 %v2524_v61  ;;  %v1388_v57 = vmul.f32 0.5, %v2275_v44  ;;  %v1391_v61 = vmax.f32 %v1389_v38, 0.0 }
 0x1b9   : > { %1284 = vmatpush.msrb.mxu0 %v2523_v60  ;;  %1257 = vmatpush.msrb.mxu3 %v2187_v34 }
 0x1ba   : > { %1213 = vmatpush.msrb.mxu2 %v2525_v41  ;;  %1153 = vmatpush.msra.mxu1 %v2527_v5 }
 0x1bb   : > { %1288 = vmatpush.msrb.mxu0 %v2526_v2  ;;  %1259 = vmatpush.msrb.mxu3 %v2198_v10  ;;  %v1390_v2 = vadd.f32 %v1388_v57, %v1925_v0 }
 0x1bc   : > { %1216 = vmatpush.msrb.mxu2 %v2528_v9  ;;  %1159 = vmatpush.msra.mxu1 %v2530_v20 }
 0x1bd   : > { %1292 = vmatpush.msrb.mxu0 %v2529_v17  ;;  %v1393_v17 = vmin.f32 %v1391_v61, 1.0  ;;  %v1392_v44 = vmax.f32 %v1390_v2, 0.0 }
 0x1be   : > { %1347 = vmatpush.msrb.mxu1 %v1961_v23  ;;  %v2536_v23 = vld [vmem:[#allocation28_spill] sm:$0xff] }
 0x1bf   : > { %1296 = vmatpush.msrb.mxu0 %v2531_v25  ;;  %v1394_v0 = vmin.f32 %v1392_v44, 1.0 }
 0x1c0   : > { %1349 = vmatpush.msrb.mxu1 %v1965_v26  ;;  %v2537_v26 = vld [vmem:[#allocation30_spill] sm:$0xff] }
 0x1c1   : > { %1300 = vmatpush.msrb.mxu0 %v2532_v19 }
 0x1c2   : > { %1351 = vmatpush.msrb.mxu1 %v1967_v27  ;;  %v2538_v27 = vld [vmem:[#allocation33_spill] sm:$0xff] }
 0x1c3   : > { %1304 = vmatpush.msrb.mxu0 %v2533_v6 }
 0x1c4   : > { %1353 = vmatpush.msrb.mxu1 %v1969_v28  ;;  %v2539_v28 = vld [vmem:[#allocation36_spill] sm:$0xff] }
 0x1c5   : > { %1308 = vmatpush.msrb.mxu0 %v2534_v22  ;;  %v1612_v22 = vld [vmem:[%s1914_s5] sm:$0xff] }
 0x1c6   : > { %1355 = vmatpush.msrb.mxu1 %v1992_v42  ;;  %v2540_v42 = vld [vmem:[#allocation40_spill] sm:$0xff] }
 0x1c7   : > { %1312 = vmatpush.msrb.mxu0 %v2535_v56  ;;  %v1395_v56 = vsub.f32 %v1393_v17, %v1612_v22 }
 0x1c8   : > { %1357 = vmatpush.msrb.mxu1 %v1994_v43  ;;  %v2541_v43 = vld [vmem:[#allocation42_spill] sm:$0xff] }
 0x1c9   : > { %1316 = vmatpush.msrb.mxu0 %v2536_v23 }
 0x1ca   : > { %1359 = vmatpush.msrb.mxu1 %v2007_v47 }
 0x1cb   : > { %1320 = vmatpush.msrb.mxu0 %v2537_v26 }
 0x1cc   : > { %1361 = vmatpush.msrb.mxu1 %v2019_v52 }
 0x1cd   : > { %1324 = vmatpush.msrb.mxu0 %v2538_v27 }
 0x1ce   : > { %1363 = vmatpush.msrb.mxu1 %v2037_v58 }
 0x1cf   : > { %1328 = vmatpush.msrb.mxu0 %v2539_v28 }
 0x1d0   : > { %1365 = vmatpush.msrb.mxu1 %v2057_v3 }
 0x1d1   : > { %1332 = vmatpush.msrb.mxu0 %v2540_v42 }
 0x1d2   : > { %1367 = vmatpush.msrb.mxu1 %v2142_v40 }
 0x1d3   : > { %1336 = vmatpush.msrb.mxu0 %v2541_v43 }
 0x1d4   : > { %1369 = vmatpush.msrb.mxu1 %v2147_v53 }
 0x1d6   : > { %1371 = vmatpush.msrb.mxu1 %v2157_v4 }
 0x1d8   : > { %1373 = vmatpush.msrb.mxu1 %v2170_v31 }
 0x1da   : > { %1375 = vmatpush.msrb.mxu1 %v2187_v34 }
 0x1dc   : > { %1377 = vmatpush.msrb.mxu1 %v2198_v10 }
 0x20d   : > { %v849_v47 = vpop.f32.mrf.mxu0 }
 0x213   : > { %v1008_v13 = vpop.f32.mrf.mxu3 }
 0x216   : > { %v888_v52 = vpop.f32.mrf.mxu1 }
 0x217   : > { %v857_v58 = vpop.f32.mrf.mxu0  ;;  %v889_v45 = vadd.f32 %v888_v52, %v849_v47 }
 0x218   : > { %v981_v46 = vpop.f32.mrf.mxu2 }
 0x21b   : > { %v1012_v62 = vpop.f32.mrf.mxu3 }
 0x21e   : > { %v892_v3 = vpop.f32.mrf.mxu1 }
 0x21f   : > { %v918_v63 = vpop.f32.mrf.mxu0  ;;  %v893_v4 = vadd.f32 %v892_v3, %v857_v58  ;;  %v1613_v58 = vld [vmem:[%s1914_s5 + $0x8] sm:$0xff] }
 0x220   : > { %v919_v40 = vadd.f32 %v918_v63, %v889_v45  ;;  %v985_v49 = vpop.f32.mrf.mxu2  ;;  %v1396_v3 = vsub.f32 %v1394_v0, %v1613_v58 }
 0x226   : > { %v948_v8 = vpop.f32.mrf.mxu1 }
 0x227   : > { %v949_v24 = vadd.f32 %v948_v8, %v919_v40  ;;  %v923_v30 = vpop.f32.mrf.mxu0 }
 0x228   : > { %v924_v18 = vadd.f32 %v923_v30, %v893_v4 }
 0x229   : > { %v982_v53 = vadd.f32 %v981_v46, %v949_v24 }
 0x22b   : > { %v1009_v21 = vadd.f32 %v1008_v13, %v982_v53 }
 0x22d   : > { %v1047_v31 = vand.u32 4294901760, %v1009_v21 }
 0x22e   : > { %v954_v34 = vpop.f32.mrf.mxu1 }
 0x22f   : > { %v1048_v10 = vsub.f32 %v1009_v21, %v1047_v31  ;;  %v955_v39 = vadd.f32 %v954_v34, %v924_v18  ;;  %1161 = vmatmul.f32.vlgmr.msra.gmra.mxu1 %v1047_v31 }
 0x231   : > { %v1049_v29 = vand.u32 4294901760, %v1048_v10  ;;  %v986_v54 = vadd.f32 %v985_v49, %v955_v39  ;;  %1219 = vmatmul.f32.vlgmr.msrb.gmra.mxu2 %v1048_v10 }
 0x233   : > { %v1050_v14 = vsub.f32 %v1048_v10, %v1049_v29  ;;  %v1013_v32 = vadd.f32 %v1012_v62, %v986_v54  ;;  %1263 = vmatmul.f32.vlgmr.msrb.gmra.mxu3 %v1049_v29 }
 0x235   : > { %v1055_v59 = vand.u32 4294901760, %v1013_v32  ;;  %v1051_v7 = vand.u32 4294901760, %v1050_v14 }
 0x237   : > { %v1056_v11 = vsub.f32 %v1013_v32, %v1055_v59  ;;  %1052 = vmatmul.f32.vlgmr.msra.gmra.mxu0 %v1051_v7  ;;  %1165 = vmatmul.f32.gmra.mxu1 %v1055_v59 }
 0x239   : > { %1224 = vmatmul.f32.gmra.mxu2 %v1056_v11  ;;  %v1057_v12 = vand.u32 4294901760, %v1056_v11 }
 0x23b   : > { %1269 = vmatmul.f32.gmra.mxu3 %v1057_v12  ;;  %v1058_v15 = vsub.f32 %v1056_v11, %v1057_v12 }
 0x23d   : > { %v1059_v16 = vand.u32 4294901760, %v1058_v15 }
 0x23f   : > { %1060 = vmatmul.f32.gmra.mxu0 %v1059_v16  ;;  %1379 = vmatmul.f32.vlgmr.msrb.gmra.mxu1 %v1047_v31 }
 0x247   : > { %1338 = vmatmul.f32.vlgmr.msrb.gmra.mxu0 %v1047_v31  ;;  %1383 = vmatmul.f32.gmra.mxu1 %v1055_v59 }
 0x24f   : > { %1342 = vmatmul.f32.gmra.mxu0 %v1055_v59 }
 0x2ac   : > { %v1162_v33 = vpop.f32.mrf.mxu1 }
 0x2b4   : > { %v1053_v35 = vpop.f32.mrf.mxu0  ;;  %v1166_v37 = vpop.f32.mrf.mxu1 }
 0x2b5   : > { %v1163_v50 = vadd.f32 %v1162_v33, %v1053_v35  ;;  %v1220_v51 = vpop.f32.mrf.mxu2 }
 0x2b6   : > { %v1264_v41 = vpop.f32.mrf.mxu3 }
 0x2b7   : > { %v1221_v60 = vadd.f32 %v1220_v51, %v1163_v50 }
 0x2b9   : > { %v1265_v5 = vadd.f32 %v1264_v41, %v1221_v60 }
 0x2bc   : > { %v1061_v55 = vpop.f32.mrf.mxu0  ;;  %v1380_v20 = vpop.f32.mrf.mxu1 }
 0x2bd   : > { %v1167_v9 = vadd.f32 %v1166_v37, %v1061_v55  ;;  %v1225_v1 = vpop.f32.mrf.mxu2 }
 0x2be   : > { %v1270_v26 = vpop.f32.mrf.mxu3 }
 0x2bf   : > { %v1226_v19 = vadd.f32 %v1225_v1, %v1167_v9 }
 0x2c1   : > { %v1271_v27 = vadd.f32 %v1270_v26, %v1226_v19 }
 0x2c4   : > { %v1339_v48 = vpop.f32.mrf.mxu0  ;;  %v1384_v47 = vpop.f32.mrf.mxu1 }
 0x2c5   : > { %v1340_v25 = vadd.f32 %v1339_v48, %v1265_v5 }
 0x2c7   : > { %v1381_v6 = vadd.f32 %v1380_v20, %v1340_v25 }
 0x2c9   : > { %v1397_v23 = vmul.f32 %v1395_v56, %v1381_v6 }
 0x2cb   : > { %v1399_v28 = vadd.f32 %v1612_v22, %v1397_v23 }
 0x2cc   : > { %v1343_v42 = vpop.f32.mrf.mxu0 }
 0x2cd   : > { %1401 = vst [vmem:[%s223_s23] sm:$0xff] %v1399_v28  ;;  %v1344_v43 = vadd.f32 %v1343_v42, %v1271_v27 }
 0x2cf   : > { %v1385_v52 = vadd.f32 %v1384_v47, %v1344_v43 }
 0x2d1   : > { %v1398_v63 = vmul.f32 %v1396_v3, %v1385_v52 }
 0x2d3   : > { %v1400_v45 = vadd.f32 %v1613_v58, %v1398_v63 }
 0x2d5   : > { %1402 = vst [vmem:[%s223_s23 + $0x8] sm:$0xff] %v1400_v45 }
 0x2d6   : > { %1731 = shalt.err (!%p1728_p10)
}
 0x2d7   : > { %s1782_s11 = smov 128   ;;  %s1783_s24 = smov 8  }
 0x2d8   : > { %1549 = dma.vmem_to_hbm [thread:$0]  (%p1875_p0), %s1417_s27, 256, %s1419_s16, %s1404_s28, %s1782_s11, %s1782_s11, %s1783_s24  }
 0x2d9 PF: > { %p1571_p11 = scmp.ge.s32.totalorder %s1774_s15, 2  ;;  %s1433_s25 = sand.u32 1, %s1762_s12  }
 0x2da   : > { %s1434_s5 = scalar_lea.sflag [#allocation4], %s1433_s25 }
 0x2db   : > { %p1563_p12 = pnand %p1571_p11, %p1839_p6 }
 0x2dd   : > { %p1564_p13 = pneg %p1563_p12 }
 0x2df   : > { %1757 = dma.done.wait (%p1564_p13), %s1434_s5, 256  }
 0x2e0   : > { %1759 = vsyncadd (%p1564_p13), %s1434_s5, 4294967040  ;;  %p17_p3 = scmp.ge.s32.totalorder %s1865_s6, 10   ;;  %s2542_s12 = smov %s1766_s13 }
 0x2e1   : > { %s2543_s13 = smov %s1770_s14  ;;  %s2544_s14 = smov %s1881_s10 }
 0x2e2   : > { %s2545_s15 = smov %s1865_s6  ;;  %19 = sbr.rel (!%p17_p3) target bundleno = 6 (0x6), region = 85 }
 0x2e7   :  { %1440 = vsyncpa [#allocation3], 1 }
 0x2e8   :  { %1442 = vsyncpa [#allocation3 + $0x1], 1 }
 0x2e9   :  { %1443 = vsyncpa [#allocation6], 1 }
 0x2ea   :  { %1444 = vsyncpa [#allocation4], 1 }
 0x2eb   :  { %1446 = vsyncpa [#allocation4 + $0x1], 1 }

</bundles_post_ra>
